<compile_context>
chip_gen: v7x
topology: tpu7x:2x2x1
jax: 0.10.0
libtpu: 0.0.40
codegen_flags: <defaults>
</compile_context>

<pallas_src>
import jax
import jax.numpy as jnp
from jax import lax
from jax.experimental import pallas as pl
from jax.experimental.pallas import tpu as pltpu


def _round_up(x, m):
    return ((x + m - 1) // m) * m


def _choose_tiling(p, spatial_tile=None, cap=16384, lane=128):
    """Pick (spatial tile Pt, padded extent P_pad).  Pt is a multiple of 128."""
    if spatial_tile is not None:
        assert spatial_tile % lane == 0, "spatial_tile must be a multiple of 128"
        return spatial_tile, _round_up(p, spatial_tile)
    p_lane = _round_up(p, lane)
    if p_lane <= cap:
        return p_lane, p_lane                      # one big tile
    n = -(-p_lane // cap)                          # number of tiles
    pt = _round_up(-(-p_lane // n), 1024)          # keep LC=512 a divisor
    return pt, pt * n


def _make_kernel(*, C, F, LC, n_chunks, P_true, pad_count, compute_dtype,
                 use_mxu):
    """Build the fused Pipeline kernel for a fixed static configuration."""

    def kernel(x_ref, q_ref, wg_ref, bg_ref, wq_ref, bq_ref, wd_ref, bd_ref,
               out_ref, acc_ref):
        # x_ref   : [1, C, Pt]     gallery pixels (channels->sublanes, spatial->lanes)
        # q_ref   : [1, 1, Dq]     query vector for batch b
        # wg_ref  : [C, F, LC] (VPU path, lane-replicated) or [F, C] (MXU path)
        # bg_ref  : [F, LC]    (VPU path, lane-replicated) or [F, 1] (MXU path)
        # wq_ref  : [F, Dq], bq_ref: [F, 1], wd_ref: [F, O], bd_ref: [1, O]
        # out_ref : [1, 1, O]
        # acc_ref : [F, 128]  f32 running per-lane-group sum of relu'd features
        k = pl.program_id(1)
        n_k = pl.num_programs(1)

        @pl.when(k == 0)
        def _init():
            acc_ref[...] = jnp.zeros_like(acc_ref)

        if use_mxu:
            wg_m = wg_ref[...].astype(compute_dtype)      # [F, C]
            bg_m = bg_ref[...]                            # [F, 1] f32

        def encode_chunk(xc):
            """xc: [C, LC] -> relu(Wg x + bg) folded to [F, 128] f32 partials."""
            if use_mxu:
                y = lax.dot_general(wg_m, xc, (((1,), (0,)), ((), ())),
                                    preferred_element_type=jnp.float32)
                y = jnp.maximum(y + bg_m, 0.0)            # [F, LC] f32
            else:
                # C is tiny -> unrolled VPU multiply-adds.  Weight/bias operands
                # are lane-replicated in VMEM (plain vector loads on the slack
                # load slots); the only in-loop broadcast left is the sublane
                # broadcast of each x row.
                # TODO(synk): a stride-0 sublane-broadcast load of the x row
                # would move that onto the load slots as well.
                y = wg_ref[0] * xc[0:1, :]
                for c in range(1, C):
                    y = y + wg_ref[c] * xc[c:c + 1, :]
                y = jnp.maximum(y + bg_ref[...], 0.0).astype(jnp.float32)
            part = y[:, 0:128]
            for t in range(1, LC // 128):                 # vreg-granular VPU adds
                part = part + y[:, t * 128:(t + 1) * 128]
            return part                                   # [F, 128] f32

        if n_chunks == 1:
            part = encode_chunk(x_ref[0].astype(compute_dtype))
        elif n_chunks <= 8:
            part = encode_chunk(x_ref[0, :, 0:LC].astype(compute_dtype))
            for j in range(1, n_chunks):
                xs = x_ref[0, :, j * LC:(j + 1) * LC].astype(compute_dtype)
                part = part + encode_chunk(xs)
        else:
            def body(j, carry):
                off = pl.multiple_of(j * LC, 128)
                xs = x_ref[0, :, pl.ds(off, LC)].astype(compute_dtype)
                return carry + encode_chunk(xs)
            part = lax.fori_loop(0, n_chunks, body,
                                 jnp.zeros((F, 128), jnp.float32))

        # Single small read-modify-write per grid step ([F,128], not [F,Pt]).
        acc_ref[...] += part

        # ---- Final step: spatial mean, query encoder, decoder. ----
        @pl.when(k == n_k - 1)
        def _finalize():
            total = jnp.sum(acc_ref[...], axis=1, keepdims=True)   # [F,1] XLU
            if pad_count:
                # Padded (x == 0) pixels each contributed relu(bg); subtract
                # them so padding never perturbs the spatial mean.
                if use_mxu:
                    pad_feat = jnp.maximum(bg_m, 0.0)
                else:
                    pad_feat = jnp.maximum(bg_ref[:, 0:1],
                                           0.0).astype(jnp.float32)
                total = total - float(pad_count) * pad_feat
            g = total * (1.0 / float(P_true))                       # [F, 1]

            # QueryEncoder: relu(q @ Wq + bq)
            q_row = q_ref[0].astype(jnp.float32)                    # [1, Dq]
            qf = jnp.sum(wq_ref[...] * q_row, axis=1,
                         keepdims=True) + bq_ref[...]
            qf = jnp.maximum(qf, 0.0)                               # [F, 1]

            # GalleryDecoder: relu((g * qf) @ Wd + bd)
            fused = g * qf                                          # [F, 1]
            o = jnp.sum(wd_ref[...] * fused, axis=0, keepdims=True)  # [1, O]
            out_ref[0] = jnp.maximum(o + bd_ref[...], 0.0)

    return kernel


def pipeline_forward(x_nchw, q, params, *, spatial_tile=None, x_dtype=None,
                     compute_dtype=jnp.float32):
    """x_nchw: [B, C, H, W] (PyTorch layout), q: [B, Dq] -> [B, O]."""
    wg, bg, wq, bq, wd, bd = params
    B, C, H, W = x_nchw.shape
    P = H * W
    Dq = q.shape[1]
    F = wg.shape[1]
    O = wd.shape[1]

    Pt, P_pad = _choose_tiling(P, spatial_tile)
    n_k = P_pad // Pt
    pad_count = P_pad - P
    LC = next(c for c in (512, 256, 128) if Pt % c == 0)
    n_chunks = Pt // LC
    use_mxu = (C >= 32) or (F >= 128)   # MXU only pays off for wide encoders

    # NCHW -> [B, C, H*W]: spatial goes to lanes; zero-pad to a tile multiple.
    x_bcp = x_nchw.reshape(B, C, P)
    if pad_count:
        x_bcp = jnp.pad(x_bcp, ((0, 0), (0, 0), (0, pad_count)))
    if x_dtype is not None:              # bf16 stream halves HBM bytes (all gens)
        x_bcp = x_bcp.astype(x_dtype)
    q3 = q.reshape(B, 1, Dq)

    # Kernel-friendly parameter layouts (features on sublanes).
    wq_t = jnp.asarray(wq, jnp.float32).T             # [F, Dq]
    bq_c = jnp.asarray(bq, jnp.float32).reshape(F, 1)
    wd_m = jnp.asarray(wd, jnp.float32)               # [F, O]
    bd_r = jnp.asarray(bd, jnp.float32).reshape(1, O)

    const2 = lambda b, k: (0, 0)
    const3 = lambda b, k: (0, 0, 0)
    if use_mxu:
        wg_in = jnp.asarray(wg, jnp.float32).T                     # [F, C]
        bg_in = jnp.asarray(bg, jnp.float32).reshape(F, 1)
        wg_spec = pl.BlockSpec((F, C), const2)
        bg_spec = pl.BlockSpec((F, 1), const2)
    else:
        # Lane-replicate encoder weights/bias (tiny, VMEM-resident) so the
        # per-chunk MAC reads lane-dense operands instead of broadcasting.
        cdt = jnp.dtype(compute_dtype)
        wg_in = jnp.broadcast_to(jnp.asarray(wg, cdt)[:, :, None], (C, F, LC))
        bg_in = jnp.broadcast_to(jnp.asarray(bg, cdt).reshape(F, 1), (F, LC))
        wg_spec = pl.BlockSpec((C, F, LC), const3)
        bg_spec = pl.BlockSpec((F, LC), const2)

    kernel = _make_kernel(C=C, F=F, LC=LC, n_chunks=n_chunks, P_true=P,
                          pad_count=pad_count, compute_dtype=compute_dtype,
                          use_mxu=use_mxu)

    grid_spec = pltpu.PrefetchScalarGridSpec(
        num_scalar_prefetch=0,
        grid=(B, n_k),
        in_specs=[
            pl.BlockSpec((1, C, Pt), lambda b, k: (b, 0, k)),   # x: streamed
            pl.BlockSpec((1, 1, Dq), lambda b, k: (b, 0, 0)),   # q: per batch
            wg_spec,
            bg_spec,
            pl.BlockSpec((F, Dq), const2),
            pl.BlockSpec((F, 1), const2),
            pl.BlockSpec((F, O), const2),
            pl.BlockSpec((1, O), const2),
        ],
        out_specs=pl.BlockSpec((1, 1, O), lambda b, k: (b, 0, 0)),
        scratch_shapes=[pltpu.VMEM((F, 128), jnp.float32)],
    )

    param_bytes = sum(int(a.size) * a.dtype.itemsize
                      for a in (wg_in, bg_in, wq_t, bq_c, wd_m, bd_r))
    cost = pl.CostEstimate(
        flops=2 * B * P_pad * C * F + 2 * B * Dq * F + 2 * B * F * O,
        transcendentals=0,
        bytes_accessed=(int(x_bcp.size) * x_bcp.dtype.itemsize
                        + int(q3.size) * 4 + param_bytes + B * O * 4),
    )

    out3 = pl.pallas_call(
        kernel,
        out_shape=jax.ShapeDtypeStruct((B, 1, O), jnp.float32),
        grid_spec=grid_spec,
        compiler_params=pltpu.CompilerParams(
            dimension_semantics=("parallel", "arbitrary"),
            vmem_limit_bytes=32 * 1024 * 1024,   # safe on v5e/v6e/v7x
        ),
        cost_estimate=cost,
    )(x_bcp, q3, wg_in, bg_in, wq_t, bq_c, wd_m, bd_r)
    return out3.reshape(B, O)


def init_params(key, c_in, d_query, hidden, out_dim):
    k1, k2, k3, k4, k5, k6 = jax.random.split(key, 6)
    wg = jax.random.normal(k1, (c_in, hidden), jnp.float32) * 0.1
    bg = jax.random.normal(k2, (hidden,), jnp.float32) * 0.1
    wq = jax.random.normal(k3, (d_query, hidden), jnp.float32) * 0.1
    bq = jax.random.normal(k4, (hidden,), jnp.float32) * 0.1
    wd = jax.random.normal(k5, (hidden, out_dim), jnp.float32) * 0.1
    bd = jax.random.normal(k6, (out_dim,), jnp.float32) * 0.1
    return wg, bg, wq, bq, wd, bd


def pipeline_reference(x_nchw, q, params):
    """Pure-JAX reference for the same synthetic architecture."""
    wg, bg, wq, bq, wd, bd = params
    B, C, H, W = x_nchw.shape
    x_bpc = jnp.transpose(x_nchw, (0, 2, 3, 1)).reshape(B, H * W, C)
    g = jnp.mean(jnp.maximum(jnp.einsum("bpc,cf->bpf", x_bpc, wg) + bg, 0.0),
                 axis=1)
    qf = jnp.maximum(q @ wq + bq, 0.0)
    return jnp.maximum((g * qf) @ wd + bd, 0.0)


if __name__ == "__main__":
    B, C, H, W = 2, 4, 16, 16     # gallery images (x_batch, NCHW)
    Dq = 8                        # query dim      (q_batch)
    HIDDEN = 32
    OUT = 16

    key = jax.random.PRNGKey(0)
    kx, kq, kp, kx2 = jax.random.split(key, 4)

    x_batch = jax.random.normal(kx, (B, C, H, W), jnp.float32)
    q_batch = jax.random.normal(kq, (B, Dq), jnp.float32)
    params = init_params(kp, C, Dq, HIDDEN, OUT)
    ref = pipeline_reference(x_batch, q_batch, params)

    # 1) f32, spatial_tile=128 -> 2 accumulation grid steps, exercising the
    #    init / accumulate / finalize path of the [F,128] scratch.
    out = pipeline_forward(x_batch, q_batch, params, spatial_tile=128)
    jax.block_until_ready(out)
    assert out.shape == (B, OUT)
    assert jnp.allclose(out, ref, atol=1e-4, rtol=1e-4), (
        float(jnp.max(jnp.abs(out - ref))))

    # 2) Non-128-divisible spatial extent -> padded tile + exact pad correction.
    x_odd = jax.random.normal(kx2, (B, C, 15, 15), jnp.float32)
    out_odd = pipeline_forward(x_odd, q_batch, params)        # auto tiling
    jax.block_until_ready(out_odd)
    ref_odd = pipeline_reference(x_odd, q_batch, params)
    assert jnp.allclose(out_odd, ref_odd, atol=1e-4, rtol=1e-4), (
        float(jnp.max(jnp.abs(out_odd - ref_odd))))

    # 3) bf16 x stream + bf16 per-pixel compute (v6e/v7x VALU lever; f32 accum).
    out_bf = pipeline_forward(x_batch, q_batch, params, spatial_tile=128,
                              x_dtype=jnp.bfloat16,
                              compute_dtype=jnp.bfloat16)
    jax.block_until_ready(out_bf)
    assert jnp.allclose(out_bf, ref, atol=3e-2, rtol=3e-2), (
        float(jnp.max(jnp.abs(out_bf - ref))))

    print("KERNEL_OK")
</pallas_src>

<mosaic_0001>
module attributes {stable_mosaic.version = 11 : i64} {
  func.func @kernel(%arg0: i32, %arg1: i32, %arg2: memref<1x4x128xf32, #tpu.memory_space<vmem>>, %arg3: memref<1x1x8xf32, #tpu.memory_space<vmem>>, %arg4: memref<4x32x128xf32, #tpu.memory_space<vmem>>, %arg5: memref<32x128xf32, #tpu.memory_space<vmem>>, %arg6: memref<32x8xf32, #tpu.memory_space<vmem>>, %arg7: memref<32x1xf32, #tpu.memory_space<vmem>>, %arg8: memref<32x16xf32, #tpu.memory_space<vmem>>, %arg9: memref<1x16xf32, #tpu.memory_space<vmem>>, %arg10: memref<1x1x16xf32, #tpu.memory_space<vmem>>, %arg11: memref<32x128xf32, #tpu.memory_space<vmem>>) attributes {dimension_semantics = [#tpu.dimension_semantics<parallel>, #tpu.dimension_semantics<arbitrary>], iteration_bounds = array<i64: 2, 2>, scalar_prefetch = 0 : i64, scratch_operands = 1 : i64, tpu.core_type = #tpu.core_type<tc>, window_params = [{transform_indices = @transform_0, window_bounds = array<i64: 1, 4, 128>}, {transform_indices = @transform_1, window_bounds = array<i64: 1, 1, 8>}, {pipeline_mode = #tpu.pipeline_mode<synchronous>, transform_indices = @transform_2, window_bounds = array<i64: 4, 32, 128>}, {pipeline_mode = #tpu.pipeline_mode<synchronous>, transform_indices = @transform_3, window_bounds = array<i64: 32, 128>}, {pipeline_mode = #tpu.pipeline_mode<synchronous>, transform_indices = @transform_4, window_bounds = array<i64: 32, 8>}, {pipeline_mode = #tpu.pipeline_mode<synchronous>, transform_indices = @transform_5, window_bounds = array<i64: 32, 1>}, {pipeline_mode = #tpu.pipeline_mode<synchronous>, transform_indices = @transform_6, window_bounds = array<i64: 32, 16>}, {pipeline_mode = #tpu.pipeline_mode<synchronous>, transform_indices = @transform_7, window_bounds = array<i64: 1, 16>}, {transform_indices = @transform_8, window_bounds = array<i64: 1, 1, 16>}]} {
    %c0_i32 = arith.constant 0 : i32
    %0 = arith.cmpi eq, %arg1, %c0_i32 : i32
    %1 = arith.extui %0 : i1 to i32
    %c0_i32_0 = arith.constant 0 : i32
    %2 = arith.cmpi ne, %1, %c0_i32_0 : i32
    scf.if %2 {
      %cst_19 = arith.constant 0.000000e+00 : f32
      %38 = vector.broadcast %cst_19 : f32 to vector<32x128xf32>
      %c0_20 = arith.constant 0 : index
      %c0_21 = arith.constant 0 : index
      %39 = vector.load %arg11[%c0_20, %c0_21] : memref<32x128xf32, #tpu.memory_space<vmem>>, vector<32x128xf32>
      tpu.vector_store %arg11[%c0_20, %c0_21], %38 {strides = array<i32>} : memref<32x128xf32, #tpu.memory_space<vmem>>, vector<32x128xf32>,
    } else {
    }
    %c0 = arith.constant 0 : index
    %c0_1 = arith.constant 0 : index
    %c0_2 = arith.constant 0 : index
    %3 = vector.load %arg2[%c0, %c0_1, %c0_2] : memref<1x4x128xf32, #tpu.memory_space<vmem>>, vector<1x4x128xf32>
    %4 = vector.shape_cast %3 : vector<1x4x128xf32> to vector<4x128xf32>
    %c0_3 = arith.constant 0 : index
    %c0_4 = arith.constant 0 : index
    %c0_5 = arith.constant 0 : index
    %5 = vector.load %arg4[%c0_3, %c0_4, %c0_5] : memref<4x32x128xf32, #tpu.memory_space<vmem>>, vector<1x32x128xf32>
    %6 = vector.shape_cast %5 : vector<1x32x128xf32> to vector<32x128xf32>
    %7 = vector.extract_strided_slice %4 {offsets = [0, 0], sizes = [1, 128], strides = [1, 1]} : vector<4x128xf32> to vector<1x128xf32>
    %8 = vector.broadcast %7 : vector<1x128xf32> to vector<32x128xf32>
    %9 = arith.mulf %6, %8 : vector<32x128xf32>
    %c1 = arith.constant 1 : index
    %c0_6 = arith.constant 0 : index
    %c0_7 = arith.constant 0 : index
    %10 = vector.load %arg4[%c1, %c0_6, %c0_7] : memref<4x32x128xf32, #tpu.memory_space<vmem>>, vector<1x32x128xf32>
    %11 = vector.shape_cast %10 : vector<1x32x128xf32> to vector<32x128xf32>
    %12 = vector.extract_strided_slice %4 {offsets = [1, 0], sizes = [1, 128], strides = [1, 1]} : vector<4x128xf32> to vector<1x128xf32>
    %13 = vector.broadcast %12 : vector<1x128xf32> to vector<32x128xf32>
    %14 = arith.mulf %11, %13 : vector<32x128xf32>
    %15 = arith.addf %9, %14 : vector<32x128xf32>
    %c2 = arith.constant 2 : index
    %c0_8 = arith.constant 0 : index
    %c0_9 = arith.constant 0 : index
    %16 = vector.load %arg4[%c2, %c0_8, %c0_9] : memref<4x32x128xf32, #tpu.memory_space<vmem>>, vector<1x32x128xf32>
    %17 = vector.shape_cast %16 : vector<1x32x128xf32> to vector<32x128xf32>
    %18 = vector.extract_strided_slice %4 {offsets = [2, 0], sizes = [1, 128], strides = [1, 1]} : vector<4x128xf32> to vector<1x128xf32>
    %19 = vector.broadcast %18 : vector<1x128xf32> to vector<32x128xf32>
    %20 = arith.mulf %17, %19 : vector<32x128xf32>
    %21 = arith.addf %15, %20 : vector<32x128xf32>
    %c3 = arith.constant 3 : index
    %c0_10 = arith.constant 0 : index
    %c0_11 = arith.constant 0 : index
    %22 = vector.load %arg4[%c3, %c0_10, %c0_11] : memref<4x32x128xf32, #tpu.memory_space<vmem>>, vector<1x32x128xf32>
    %23 = vector.shape_cast %22 : vector<1x32x128xf32> to vector<32x128xf32>
    %24 = vector.extract_strided_slice %4 {offsets = [3, 0], sizes = [1, 128], strides = [1, 1]} : vector<4x128xf32> to vector<1x128xf32>
    %25 = vector.broadcast %24 : vector<1x128xf32> to vector<32x128xf32>
    %26 = arith.mulf %23, %25 : vector<32x128xf32>
    %27 = arith.addf %21, %26 : vector<32x128xf32>
    %c0_12 = arith.constant 0 : index
    %c0_13 = arith.constant 0 : index
    %28 = vector.load %arg5[%c0_12, %c0_13] : memref<32x128xf32, #tpu.memory_space<vmem>>, vector<32x128xf32>
    %29 = arith.addf %27, %28 : vector<32x128xf32>
    %cst = arith.constant 0.000000e+00 : f32
    %30 = vector.broadcast %cst : f32 to vector<32x128xf32>
    %31 = arith.maximumf %29, %30 : vector<32x128xf32>
    %c0_14 = arith.constant 0 : index
    %c0_15 = arith.constant 0 : index
    %32 = vector.load %arg11[%c0_14, %c0_15] : memref<32x128xf32, #tpu.memory_space<vmem>>, vector<32x128xf32>
    %33 = arith.addf %32, %31 : vector<32x128xf32>
    %c0_16 = arith.constant 0 : index
    %c0_17 = arith.constant 0 : index
    %34 = vector.load %arg11[%c0_16, %c0_17] : memref<32x128xf32, #tpu.memory_space<vmem>>, vector<32x128xf32>
    tpu.vector_store %arg11[%c0_16, %c0_17], %33 {strides = array<i32>} : memref<32x128xf32, #tpu.memory_space<vmem>>, vector<32x128xf32>,
    %c1_i32 = arith.constant 1 : i32
    %35 = arith.cmpi eq, %arg1, %c1_i32 : i32
    %36 = arith.extui %35 : i1 to i32
    %c0_i32_18 = arith.constant 0 : i32
    %37 = arith.cmpi ne, %36, %c0_i32_18 : i32
    scf.if %37 {
      %c0_19 = arith.constant 0 : index
      %c0_20 = arith.constant 0 : index
      %38 = vector.load %arg11[%c0_19, %c0_20] : memref<32x128xf32, #tpu.memory_space<vmem>>, vector<32x128xf32>
      %cst_21 = arith.constant dense<0.000000e+00> : vector<32xf32>
      %39 = vector.multi_reduction <add>, %38, %cst_21 [1] : vector<32x128xf32> to vector<32xf32>
      %40 = vector.shape_cast %39 : vector<32xf32> to vector<32x1xf32>
      %cst_22 = arith.constant 3.906250e-03 : f32
      %41 = vector.broadcast %cst_22 : f32 to vector<32x1xf32>
      %42 = arith.mulf %40, %41 : vector<32x1xf32>
      %c0_23 = arith.constant 0 : index
      %c0_24 = arith.constant 0 : index
      %c0_25 = arith.constant 0 : index
      %43 = vector.load %arg3[%c0_23, %c0_24, %c0_25] : memref<1x1x8xf32, #tpu.memory_space<vmem>>, vector<1x1x8xf32>
      %44 = vector.shape_cast %43 : vector<1x1x8xf32> to vector<1x8xf32>
      %c0_26 = arith.constant 0 : index
      %c0_27 = arith.constant 0 : index
      %45 = vector.load %arg6[%c0_26, %c0_27] : memref<32x8xf32, #tpu.memory_space<vmem>>, vector<32x8xf32>
      %46 = vector.broadcast %44 : vector<1x8xf32> to vector<32x8xf32>
      %47 = arith.mulf %45, %46 : vector<32x8xf32>
      %cst_28 = arith.constant dense<0.000000e+00> : vector<32xf32>
      %48 = vector.multi_reduction <add>, %47, %cst_28 [1] : vector<32x8xf32> to vector<32xf32>
      %49 = vector.shape_cast %48 : vector<32xf32> to vector<32x1xf32>
      %c0_29 = arith.constant 0 : index
      %c0_30 = arith.constant 0 : index
      %50 = vector.load %arg7[%c0_29, %c0_30] : memref<32x1xf32, #tpu.memory_space<vmem>>, vector<32x1xf32>
      %51 = arith.addf %49, %50 : vector<32x1xf32>
      %cst_31 = arith.constant 0.000000e+00 : f32
      %52 = vector.broadcast %cst_31 : f32 to vector<32x1xf32>
      %53 = arith.maximumf %51, %52 : vector<32x1xf32>
      %54 = arith.mulf %42, %53 : vector<32x1xf32>
      %c0_32 = arith.constant 0 : index
      %c0_33 = arith.constant 0 : index
      %55 = vector.load %arg8[%c0_32, %c0_33] : memref<32x16xf32, #tpu.memory_space<vmem>>, vector<32x16xf32>
      %56 = vector.broadcast %54 : vector<32x1xf32> to vector<32x16xf32>
      %57 = arith.mulf %55, %56 : vector<32x16xf32>
      %cst_34 = arith.constant dense<0.000000e+00> : vector<16xf32>
      %58 = vector.multi_reduction <add>, %57, %cst_34 [0] : vector<32x16xf32> to vector<16xf32>
      %59 = vector.shape_cast %58 : vector<16xf32> to vector<1x16xf32>
      %c0_35 = arith.constant 0 : index
      %c0_36 = arith.constant 0 : index
      %60 = vector.load %arg9[%c0_35, %c0_36] : memref<1x16xf32, #tpu.memory_space<vmem>>, vector<1x16xf32>
      %61 = arith.addf %59, %60 : vector<1x16xf32>
      %cst_37 = arith.constant 0.000000e+00 : f32
      %62 = vector.broadcast %cst_37 : f32 to vector<1x16xf32>
      %63 = arith.maximumf %61, %62 : vector<1x16xf32>
      %c0_38 = arith.constant 0 : index
      %c0_39 = arith.constant 0 : index
      %c0_40 = arith.constant 0 : index
      %64 = vector.load %arg10[%c0_38, %c0_39, %c0_40] : memref<1x1x16xf32, #tpu.memory_space<vmem>>, vector<1x1x16xf32>
      %65 = vector.shape_cast %64 : vector<1x1x16xf32> to vector<1x16xf32>
      %66 = vector.shape_cast %63 : vector<1x16xf32> to vector<1x1x16xf32>
      tpu.vector_store %arg10[%c0_38, %c0_39, %c0_40], %66 {strides = array<i32>} : memref<1x1x16xf32, #tpu.memory_space<vmem>>, vector<1x1x16xf32>,
    } else {
    }
    return
  }
  func.func @transform_0(%arg0: i32, %arg1: i32) -> (i32, i32, i32) {
    %c0_i32 = arith.constant 0 : i32
    %c0_i32_0 = arith.constant 0 : i32
    return %arg0, %c0_i32, %arg1 : i32, i32, i32
  }
  func.func @transform_1(%arg0: i32, %arg1: i32) -> (i32, i32, i32) {
    %c0_i32 = arith.constant 0 : i32
    %c0_i32_0 = arith.constant 0 : i32
    %c0_i32_1 = arith.constant 0 : i32
    return %arg0, %c0_i32, %c0_i32_0 : i32, i32, i32
  }
  func.func @transform_2(%arg0: i32, %arg1: i32) -> (i32, i32, i32) {
    %c0_i32 = arith.constant 0 : i32
    %c0_i32_0 = arith.constant 0 : i32
    %c0_i32_1 = arith.constant 0 : i32
    %c0_i32_2 = arith.constant 0 : i32
    return %c0_i32, %c0_i32_0, %c0_i32_1 : i32, i32, i32
  }
  func.func @transform_3(%arg0: i32, %arg1: i32) -> (i32, i32) {
    %c0_i32 = arith.constant 0 : i32
    %c0_i32_0 = arith.constant 0 : i32
    %c0_i32_1 = arith.constant 0 : i32
    return %c0_i32, %c0_i32_0 : i32, i32
  }
  func.func @transform_4(%arg0: i32, %arg1: i32) -> (i32, i32) {
    %c0_i32 = arith.constant 0 : i32
    %c0_i32_0 = arith.constant 0 : i32
    %c0_i32_1 = arith.constant 0 : i32
    return %c0_i32, %c0_i32_0 : i32, i32
  }
  func.func @transform_5(%arg0: i32, %arg1: i32) -> (i32, i32) {
    %c0_i32 = arith.constant 0 : i32
    %c0_i32_0 = arith.constant 0 : i32
    %c0_i32_1 = arith.constant 0 : i32
    return %c0_i32, %c0_i32_0 : i32, i32
  }
  func.func @transform_6(%arg0: i32, %arg1: i32) -> (i32, i32) {
    %c0_i32 = arith.constant 0 : i32
    %c0_i32_0 = arith.constant 0 : i32
    %c0_i32_1 = arith.constant 0 : i32
    return %c0_i32, %c0_i32_0 : i32, i32
  }
  func.func @transform_7(%arg0: i32, %arg1: i32) -> (i32, i32) {
    %c0_i32 = arith.constant 0 : i32
    %c0_i32_0 = arith.constant 0 : i32
    %c0_i32_1 = arith.constant 0 : i32
    return %c0_i32, %c0_i32_0 : i32, i32
  }
  func.func @transform_8(%arg0: i32, %arg1: i32) -> (i32, i32, i32) {
    %c0_i32 = arith.constant 0 : i32
    %c0_i32_0 = arith.constant 0 : i32
    %c0_i32_1 = arith.constant 0 : i32
    return %arg0, %c0_i32, %c0_i32_0 : i32, i32, i32
  }
}

</mosaic_0001>

<bundles_post_ra>
// kernel: tpu_custom_call.1
= control target key start
LH: loop header
LB: loop body
LE: loop exit
PB: predicated region body
PF: predicated region fallthrough
CT: control target
= control target key end

     0   :  { %s1560_s0 = inlined_call_operand.hbm [shape: f32[2,4,256], index: 0, kind: input, shape index: {}]   ;;  %s1561_s1 = inlined_call_operand.hbm [shape: f32[2,1,8], index: 1, kind: input, shape index: {}]   ;;  %s1562_s2 = inlined_call_operand.vmem [shape: f32[4,32,128], index: 2, kind: input, shape index: {}]   ;;  %s1563_s3 = inlined_call_operand.hbm [shape: f32[32,128], index: 3, kind: input, shape index: {}]   ;;  %s1564_s4 = inlined_call_operand.vmem [shape: f32[32,8], index: 4, kind: input, shape index: {}]   ;;  %s1565_s5 = inlined_call_operand.vmem [shape: f32[32,1], index: 5, kind: input, shape index: {}]   ;;  %s1566_s6 = inlined_call_operand.vmem [shape: f32[32,16], index: 6, kind: input, shape index: {}]   ;;  %s1567_s7 = inlined_call_operand.vmem [shape: f32[1,16], index: 7, kind: input, shape index: {}]   ;;  %s1568_s8 = inlined_call_operand.hbm [shape: f32[2,1,16], index: 8, kind: output, shape index: {}]  }
   0x1   :  { %1581 = sst [smem:[#allocation17_spill]] %s1560_s0 }
   0x2   :  { %1582 = sst [smem:[#allocation18_spill]] %s1563_s3 }
   0x3   :  { %1583 = sst [smem:[#allocation19_spill]] %s1564_s4 }
   0x4   :  { %1584 = sst [smem:[#allocation20_spill]] %s1565_s5 }
   0x5   :  { %1585 = sst [smem:[#allocation21_spill]] %s1566_s6 }
   0x6   :  { %1586 = sst [smem:[#allocation22_spill]] %s1567_s7 }
   0x7   :  { %1587 = sst [smem:[#allocation23_spill]] %s1568_s8 }
   0x8   :  { %13 = vsyncpa [#allocation4], 0 }
   0x9   :  { %15 = vsyncpa [#allocation4 + $0x1], 0 }
   0xa   :  { %16 = vsyncpa [#allocation7], 0 }
   0xb   :  { %18 = vsyncpa [#allocation7 + $0x1], 0 }
   0xc   :  { %19 = vsyncpa [#allocation5], 0 }
   0xd   :  { %21 = vsyncpa [#allocation5 + $0x1], 0  ;;  %s1139_s27 = smov 0   ;;  %s1141_s28 = smov 0  }
   0xe   :  { %s1143_s29 = smov 0   ;;  %s1145_s30 = smov 0  }
   0xf   :  { %s1147_s9 = smov 0   ;;  %s1149_s10 = smov 0  }
  0x10   :  { %s1151_s11 = smov 0   ;;  %s1153_s12 = smov 0  }
  0x11   :  { %s1155_s13 = smov 0   ;;  %s1157_s14 = smov 0  }
  0x12   :  { %s1159_s15 = smov 0  }
  0x13 LB: > { %1588 = sst [smem:[#allocation14_spill]] %s1072_s12  ;;  %s1195_s16 = sadd.s32 4294967295, %s1084_s15   ;;  %s1084_s15 = sphi %s1159_s15, %s27_s15   ;;  %s1080_s14 = sphi %s1157_s14, %s1632_s14   ;;  %s1076_s13 = sphi %s1155_s13, %s1631_s13   ;;  %s1072_s12 = sphi %s1153_s12, %s1630_s12   ;;  %s1068_s11 = sphi %s1151_s11, %s1629_s11   ;;  %s1064_s10 = sphi %s1149_s10, %s1628_s10   ;;  %s1060_s9 = sphi %s1147_s9, %s1627_s9   ;;  %s1056_s30 = sphi %s1145_s30, %s1626_s30   ;;  %s1052_s29 = sphi %s1143_s29, %s1625_s29   ;;  %s1048_s28 = sphi %s1141_s28, %s1624_s28   ;;  %s1044_s27 = sphi %s1139_s27, %s1623_s27  }
  0x14   : > { %p714_p0 = scmp.ge.s32.totalorder %s1084_s15, 1  ;;  %p1570_p1 = scmp.eq.s32.totalorder %s1195_s16, 0 }
  0x15   : > { %p250_p3 = scmp.lt.s32.totalorder %s1084_s15, 5  ;;  %s1086_s18 = smov [#allocation8]  }
  0x16   : > { %s265_s19 = sshll.u32 %s1086_s18, 4  ;;  %s1591_s3 = sld [smem:[#allocation18_spill]]  ;;  %s266_s19 = int_to_ptr.vmem [resolvable:$true] %s265_s19 }
  0x17   : > { %p1201_p4 = pnand %p714_p0, %p250_p3 }
  0x19   : > { %s1589_s17 = scalar_select %p1201_p4, 1, 0 }
  0x1a   : > { %p752_p5 = pneg %p1201_p4 }
  0x1c   : > { %p1209_p6 = pnand %p752_p5, %p1570_p1  ;;  %s866_s23 = scalar_lea.hbm %s1591_s3, 512 }
  0x1d   : > { %p867_p7 = scmp.ne.s32.totalorder %s1591_s3, %s866_s23  ;;  %p873_p11 = scmp.lt.u32.totalorder %s866_s23, %s1591_s3 }
  0x1e   : > { %p868_p8 = pneg %p1209_p6 }
  0x20   : > { %p869_p9 = pnand %p868_p8, %p867_p7 }
  0x22   : > { %p870_p10 = pneg %p869_p9 }
  0x24   : > { %p875_p12 = pnand %p873_p11, %p870_p10 }
  0x26   : > { %878 = shalt.err (!%p875_p12)
}
  0x27   : > { %s879_s8 = scalar_lea.vmem %s266_s19, 512  ;;  %p887_p5 = scmp.lt.s32.totalorder %s266_s19, %s266_s19 }
  0x28   : > { %p880_p13 = scmp.ne.s32.totalorder %s266_s19, %s879_s8  ;;  %p888_p2 = scmp.lt.s32.totalorder %s879_s8, %s879_s8 }
  0x2a   : > { %p882_p0 = pnand %p880_p13, %p868_p8  ;;  %p889_p1 = por %p888_p2, %p887_p5 }
  0x2c   : > { %p883_p3 = pneg %p882_p0 }
  0x2e   : > { %p890_p4 = pnand %p889_p1, %p883_p3 }
  0x30   : > { %893 = shalt.err (!%p890_p4)
}
  0x31   : > { %s1087_s21 = smov 128   ;;  %s1088_s22 = smov 8  }
  0x32   : > { %755 = dma.hbm_to_vmem [thread:$0]  (!%p1209_p6), %s1591_s3, 512, %s266_s19, [#allocation7], %s1087_s21, %s1087_s21, %s1088_s22  }
  0x33   : > { %s36_s24 = sadd.s32 1, %s1076_s13  ;;  %s39_s25 = sadd.s32 1, %s1080_s14 }
  0x34   : > { %p37_p1 = scmp.ge.s32.totalorder %s36_s24, 2  ;;  %s48_s26 = sadd.s32 1, %s1064_s10 }
  0x35   : > { %p55_p2 = scmp.ne.s32.totalorder %s1064_s10, %s1060_s9  ;;  %p1578_p4 = scmp.eq.s32.totalorder %s1084_s15, 0 }
  0x36   : > { %s1634_s24 = smov (%p37_p1, %s36_s24), 0  ;;  %s1636_s25 = smov (!%p37_p1, %s39_s25), %s1080_s14 }
  0x37   : > { %1592 = sst [smem:[#allocation15_spill]] %s1634_s24  ;;  %s44_s18 = ssub.s32 %s1076_s13, %s1634_s24 }
  0x38   : > { %p1242_p7 = por %p1578_p4, %p55_p2  ;;  %p41_p6 = scmp.ge.s32.totalorder %s1636_s25, 2 }
  0x39   : > { %p61_p8 = scmp.ne.s32.totalorder %s1060_s9, %s1056_s30  ;;  %p1577_p9 = scmp.lt.s32.totalorder %s1084_s15, 4 }
  0x3a   : > { %s291_s19 = sand.u32 1, %s1064_s10   ;;  %s1638_s25 = smov (%p41_p6, %s1636_s25), 0 }
  0x3b   : > { %1594 = sst [smem:[#allocation16_spill]] %s1638_s25  ;;  %p1595_p10 = scmp.eq.s32.totalorder %s1195_s16, 0 }
  0x3c   : > { %s1260_s22 = ssub.s32 %s1080_s14, %s1638_s25  ;;  %s717_s8 = sshll.u32 %s291_s19, 2 }
  0x3d   : > { %p1254_p11 = por %p1595_p10, %p61_p8  ;;  %s45_s23 = sor.u32 %s44_s18, %s1260_s22 }
  0x3e   : > { %p46_p13 = scmp.eq.s32.totalorder %s45_s23, 0  ;;  %s718_s30 = sshll.u32 %s1080_s14, 1 }
  0x3f   : > { %s295_s3 = scalar_lea.vmem [#allocation3], %s717_s8  ;;  %s300_s7 = sadd.s32 %s1076_s13, %s718_s30 }
  0x40   : > { %s304_s24 = sshll.u32 %s295_s3, 4  ;;  %s719_s6 = sshll.u32 %s300_s7, 6  ;;  %s1269_s24 = int_to_ptr.vmem [resolvable:$true] %s304_s24 }
  0x41   : > { %s1266_s12 = scalar_select %p46_p13, %s1064_s10, %s48_s26  }
  0x42   : > { %p1275_p0 = pnand %p1577_p9, %p1242_p7  ;;  %s1598_s0 = sld [smem:[#allocation17_spill]] }
  0x43   : > { %s292_s3 = scalar_lea.sflag [#allocation4], %s291_s19 }
  0x44   : > { %p896_p5 = pneg %p1275_p0 }
  0x48   : > { %s1282_s18 = scalar_lea.hbm %s1598_s0, %s719_s6  ;;  %s899_s4 = scalar_lea.hbm %s1598_s0, 256 }
  0x49   : > { %s894_s26 = scalar_lea.hbm %s1282_s18, 64  ;;  %p900_p7 = scmp.lt.u32.totalorder %s1282_s18, %s1598_s0 }
  0x4a   : > { %p895_p3 = scmp.ne.s32.totalorder %s1282_s18, %s894_s26  ;;  %p901_p6 = scmp.lt.u32.totalorder %s899_s4, %s894_s26 }
  0x4b   : > { %p903_p10 = scmp.lt.u32.totalorder %s894_s26, %s1282_s18 }
  0x4c   : > { %p897_p1 = pnand %p896_p5, %p895_p3  ;;  %p902_p8 = por %p901_p6, %p900_p7 }
  0x4e   : > { %p898_p2 = pneg %p897_p1  ;;  %p904_p13 = por %p903_p10, %p902_p8 }
  0x50   : > { %p905_p9 = pnand %p904_p13, %p898_p2 }
  0x52   : > { %908 = shalt.err (!%p905_p9)
}
  0x53   : > { %s909_s19 = scalar_lea.vmem %s1269_s24, 64  ;;  %s1089_s8 = smov [#allocation3]  }
  0x54   : > { %p910_p3 = scmp.ne.s32.totalorder %s1269_s24, %s909_s19  ;;  %s914_s23 = sshll.u32 %s1089_s8, 4  ;;  %s915_s23 = int_to_ptr.vmem [resolvable:$false] %s914_s23 }
  0x55   : > { %s916_s30 = scalar_lea.vmem %s915_s23, 128  ;;  %p917_p12 = scmp.lt.s32.totalorder %s1269_s24, %s915_s23 }
  0x56   : > { %p912_p1 = pnand %p910_p3, %p896_p5  ;;  %p918_p7 = scmp.lt.s32.totalorder %s916_s30, %s909_s19 }
  0x58   : > { %p913_p4 = pneg %p912_p1  ;;  %p919_p6 = por %p918_p7, %p917_p12 }
  0x5a   : > { %p920_p8 = pnand %p919_p6, %p913_p4 }
  0x5c   : > { %923 = shalt.err (!%p920_p8)
}
  0x5d   : > { %759 = dma.hbm_to_vmem [thread:$0]  (!%p1275_p0), %s1282_s18, 64, %s1269_s24, %s292_s3  }
  0x5e   : > { %s713_s26 = sadd.s32 4294967294, %s1084_s15   ;;  %s74_s7 = sadd.s32 1, %s1052_s29 }
  0x5f   : > { %p1599_p4 = scmp.eq.s32.totalorder %s1260_s22, 0  ;;  %p81_p9 = scmp.ne.s32.totalorder %s1052_s29, %s1048_s28 }
  0x60   : > { %p87_p12 = scmp.ne.s32.totalorder %s1048_s28, %s1044_s27  ;;  %p243_p5 = scmp.eq.s32.totalorder %s713_s26, 3 }
  0x61   : > { %s1314_s25 = scalar_select %p1599_p4, %s1052_s29, %s74_s7  }
  0x62   : > { %s311_s20 = sand.u32 1, %s1084_s15   ;;  %p1600_p2 = scmp.eq.s32.totalorder %s1084_s15, 0 }
  0x63   : > { %p1601_p13 = scmp.eq.s32.totalorder %s1195_s16, 0  ;;  %p1603_p1 = scmp.eq.s32.totalorder %s1195_s16, 3 }
  0x64   : > { %p83_p10 = por %p81_p9, %p1600_p2  ;;  %p1335_p0 = por %p243_p5, %p87_p12 }
  0x65   : > { %p1325_p3 = por %p87_p12, %p1601_p13  ;;  %p1331_p7 = por %p1603_p1, %p81_p9 }
  0x66   : > { %s1605_s22 = scalar_select %p1335_p0, 1, 0 }
  0x67   : > { %s1602_s4 = scalar_select %p1325_p3, 1, 0 }
  0x68   : > { %s1604_s24 = scalar_select %p1331_p7, 1, 0 }
  0x69   : > { %s313_s18 = sand.u32 1, %s1052_s29   ;;  %s720_s3 = sshll.u32 %s1080_s14, 4 }
  0x6a   : > { %s1344_s19 = scalar_lea.hbm %s1561_s1, %s720_s3  ;;  %s314_s8 = scalar_lea.vmem [#allocation6], %s313_s18 }
  0x6b   : > { %s321_s23 = sshll.u32 %s314_s8, 4  ;;  %p1606_p6 = scmp.lt.s32.totalorder %s1084_s15, 4  ;;  %s1346_s23 = int_to_ptr.vmem [resolvable:$true] %s321_s23 }
  0x6c   : > { %s312_s26 = scalar_lea.sflag [#allocation7], %s311_s20  ;;  %s924_s7 = scalar_lea.hbm %s1344_s19, 16 }
  0x6d   : > { %p1350_p8 = pnand %p1606_p6, %p83_p10  ;;  %p925_p4 = scmp.ne.s32.totalorder %s1344_s19, %s924_s7 }
  0x6e   : > { %s929_s5 = scalar_lea.hbm %s1561_s1, 32  ;;  %p930_p2 = scmp.lt.u32.totalorder %s1344_s19, %s1561_s1 }
  0x6f   : > { %p926_p9 = pneg %p1350_p8  ;;  %p931_p10 = scmp.lt.u32.totalorder %s929_s5, %s924_s7 }
  0x70   : > { %p933_p1 = scmp.lt.u32.totalorder %s924_s7, %s1344_s19 }
  0x71   : > { %p927_p12 = pnand %p926_p9, %p925_p4  ;;  %p932_p13 = por %p931_p10, %p930_p2 }
  0x73   : > { %p928_p5 = pneg %p927_p12  ;;  %p934_p6 = por %p933_p1, %p932_p13 }
  0x75   : > { %p935_p0 = pnand %p934_p6, %p928_p5 }
  0x77   : > { %938 = shalt.err (!%p935_p0)
}
  0x78   : > { %s939_s20 = scalar_lea.vmem %s1346_s23, 16  ;;  %s1090_s18 = smov [#allocation6]  }
  0x79   : > { %p940_p4 = scmp.ne.s32.totalorder %s1346_s23, %s939_s20  ;;  %s944_s3 = sshll.u32 %s1090_s18, 4  ;;  %s945_s3 = int_to_ptr.vmem [resolvable:$false] %s944_s3 }
  0x7a   : > { %s946_s6 = scalar_lea.vmem %s945_s3, 32  ;;  %p947_p3 = scmp.lt.s32.totalorder %s1346_s23, %s945_s3 }
  0x7b   : > { %p942_p12 = pnand %p940_p4, %p926_p9  ;;  %p948_p2 = scmp.lt.s32.totalorder %s946_s6, %s939_s20 }
  0x7d   : > { %p943_p7 = pneg %p942_p12  ;;  %p949_p10 = por %p948_p2, %p947_p3 }
  0x7f   : > { %p950_p13 = pnand %p949_p10, %p943_p7 }
  0x81   : > { %953 = shalt.err (!%p950_p13)
}
  0x82   : > { %762 = dma.hbm_to_vmem [thread:$0]  (!%p1350_p8), %s1344_s19, 16, %s1346_s23, %s312_s26  }
  0x83   : > { %p1608_p0 = scmp.ne.s32.totalorder %s1589_s17, 0 }
  0x84   : > { %s332_s7 = sand.u32 (!%p1608_p0), 1, %s1060_s9  }
  0x85   : > { %330 = sbr.rel (%p1608_p0) target bundleno = 523 (0x20b), region = 52  ;;  %s722_s5 = sshll.u32 (!%p1608_p0), %s332_s7, 2 }
  0x86   : > { %s333_s8 = scalar_lea.sflag (!%p1608_p0), [#allocation4], %s332_s7  ;;  %s336_s18 = scalar_lea.vmem (!%p1608_p0), [#allocation3], %s722_s5 }
  0x8c   : > { %1027 = dma.done.wait (%p1254_p11), %s333_s8, 64  }
  0x8d   : > { %1029 = vsyncadd (%p1254_p11), %s333_s8, 4294967232  ;;  %s341_s30 = sand.u32 1, %s1195_s16   ;;  %s1388_s20 = sand.u32 1, %s1048_s28  }
  0x8e   : > { %s342_s17 = scalar_lea.sflag [#allocation7], %s341_s30  ;;  %s344_s19 = scalar_lea.vmem [#allocation6], %s1388_s20 }
  0x8f   : > { %p1609_p3 = scmp.ne.s32.totalorder %s1602_s4, 0 }
  0x91   : > { %1031 = dma.done.wait (%p1609_p3), %s342_s17, 16  }
  0x92   : > { %1033 = vsyncadd (%p1609_p3), %s342_s17, 4294967280  ;;  %p1610_p7 = scmp.eq.s32.totalorder %s1195_s16, 0 }
  0x94   : > { %1035 = dma.done.wait (%p1610_p7), [#allocation7], 512   ;;  %p1611_p8 = pmov %p1610_p7 }
  0x95   : > { %s383_s21 = scalar_lea.vmem [#allocation9], %s1388_s20  ;;  %p724_p11 = scmp.ne.s32.totalorder %s1068_s11, 0 }
  0x96   : > { %1037 = vsyncadd (%p1611_p8), [#allocation7], 4294966784  ;;  %v1091_v0 = vmov (!%p724_p11), 0.0  }
  0x97   : > { %387 = sbr.rel (%p724_p11) target bundleno = 158 (0x9e), region = 68  ;;  %388 = vst [vmem:[#allocation2] sm:$0xff] (!%p724_p11), %v1091_v0  ;;  %389 = vst [vmem:[#allocation2 + $0x8] sm:$0xff] (!%p724_p11), %v1091_v0 }
  0x98   : > { %390 = vst [vmem:[#allocation2 + $0x10] sm:$0xff] (!%p724_p11), %v1091_v0  ;;  %391 = vst [vmem:[#allocation2 + $0x18] sm:$0xff] (!%p724_p11), %v1091_v0 }
  0x9e PF: > { %v397_v1 = vlaneseq  ;;  %v392_v3 = vld [vmem:[%s336_s18] sm:$0xf]  ;;  %v394_v16 = vld [vmem:[%s1562_s2 + $0x8] sm:$0xff]  ;;  %v395_v19 = vld [vmem:[%s1562_s2 + $0x10] sm:$0xff]  ;;  %p737_p9 = scmp.ne.s32.totalorder %s1068_s11, 1 }
  0x9f   : > { %v393_v4 = vld [vmem:[%s1562_s2] sm:$0xff]  ;;  %v726_v17 = vld [vmem:[%s1562_s2 + $0x28] sm:$0xff]  ;;  %v727_v20 = vld [vmem:[%s1562_s2 + $0x30] sm:$0xff]  ;;  %s1612_s30 = sld [smem:[#allocation19_spill]] (!%p737_p9)  ;;  %vm515_vm0 = vcmask (!%p737_p9), 64512   ;;  %s1614_s7 = sld [smem:[#allocation20_spill]] (!%p737_p9) }
  0xa0   : > { %v398_v2 = vshrl.u32 %v397_v1, 7  ;;  %v725_v9 = vld [vmem:[%s1562_s2 + $0x20] sm:$0xff]  ;;  %v730_v18 = vld [vmem:[%s1562_s2 + $0x48] sm:$0xff]  ;;  %v731_v21 = vld [vmem:[%s1562_s2 + $0x50] sm:$0xff]  ;;  %vm572_vm1 = vcmask (!%p737_p9), 130048   ;;  %s1616_s23 = sld [smem:[#allocation22_spill]] (!%p737_p9) }
  0xa1   : > { %v729_v10 = vld [vmem:[%s1562_s2 + $0x40] sm:$0xff]  ;;  %v734_v25 = vld [vmem:[%s1562_s2 + $0x68] sm:$0xff]  ;;  %v396_v26 = vld [vmem:[%s1562_s2 + $0x18] sm:$0xff]  ;;  %vm589_vm2 = vcmask (!%p737_p9), 122880  }
  0xa2   : > { %v399_v5 = vsub.s32 0, %v398_v2  ;;  %v412_v6 = vsub.s32 1, %v398_v2  ;;  %v429_v7 = vsub.s32 2, %v398_v2  ;;  %v446_v8 = vsub.s32 3, %v398_v2  ;;  %v733_v11 = vld [vmem:[%s1562_s2 + $0x60] sm:$0xff]  ;;  %v728_v27 = vld [vmem:[%s1562_s2 + $0x38] sm:$0xff] }
  0xa3   : > { %v735_v32 = vld [vmem:[%s1562_s2 + $0x70] sm:$0xff]  ;;  %v732_v33 = vld [vmem:[%s1562_s2 + $0x58] sm:$0xff]  ;;  %v459_v59 = vld [vmem:[#allocation8 + $0x18] sm:$0xff] }
  0xa4   : > { %v400_v12 = vrot.slane %v392_v3, %v399_v5  ;;  %v413_v13 = vrot.slane %v392_v3, %v412_v6  ;;  %v430_v14 = vrot.slane %v392_v3, %v429_v7  ;;  %v447_v15 = vrot.slane %v392_v3, %v446_v8  ;;  %v736_v38 = vld [vmem:[%s1562_s2 + $0x78] sm:$0xff]  ;;  %v456_v47 = vld [vmem:[#allocation8] sm:$0xff]  ;;  %v468_v60 = vld [vmem:[#allocation2] sm:$0xff] }
  0xa5   : > { %v457_v52 = vld [vmem:[#allocation8 + $0x8] sm:$0xff]  ;;  %v458_v55 = vld [vmem:[#allocation8 + $0x10] sm:$0xff]  ;;  %v469_v0 = vld [vmem:[#allocation2 + $0x8] sm:$0xff]  ;;  %s1613_s17 = smov (!%p737_p9), %s1612_s30 }
  0xa6   : > { %v401_v22 = vmul.f32 %v400_v12, %v393_v4  ;;  %v414_v23 = vmul.f32 %v725_v9, %v413_v13  ;;  %v431_v24 = vmul.f32 %v729_v10, %v430_v14  ;;  %v448_v28 = vmul.f32 %v733_v11, %v447_v15  ;;  %v470_v3 = vld [vmem:[#allocation2 + $0x10] sm:$0xff]  ;;  %v471_v7 = vld [vmem:[#allocation2 + $0x18] sm:$0xff] }
  0xa7   : > { %v402_v29 = vmul.f32 %v400_v12, %v394_v16  ;;  %v415_v30 = vmul.f32 %v726_v17, %v413_v13  ;;  %v432_v31 = vmul.f32 %v730_v18, %v430_v14  ;;  %v403_v35 = vmul.f32 %v400_v12, %v395_v19  ;;  %v502_v16 = vld [vmem:[%s1613_s17 + $0x8] sm:$0xff] (!%p737_p9)  ;;  %v503_v19 = vld [vmem:[%s1613_s17 + $0x10] sm:$0xff] (!%p737_p9) }
  0xa8   : > { %v418_v34 = vadd.f32 %v414_v23, %v401_v22  ;;  %v416_v36 = vmul.f32 %v727_v20, %v413_v13  ;;  %v433_v37 = vmul.f32 %v731_v21, %v430_v14  ;;  %v449_v40 = vmul.f32 %v734_v25, %v447_v15 }
  0xa9   : > { %v419_v39 = vadd.f32 %v415_v30, %v402_v29  ;;  %v404_v41 = vmul.f32 %v400_v12, %v396_v26  ;;  %v417_v42 = vmul.f32 %v728_v27, %v413_v13  ;;  %v450_v45 = vmul.f32 %v735_v32, %v447_v15  ;;  %v738_v12 = vld [vmem:[%s344_s19] ss:$0 sm:$0xff] (!%p737_p9)  ;;  %s1615_s19 = sld [smem:[#allocation21_spill]] (!%p737_p9) }
  0xaa   : > { %v435_v43 = vadd.f32 %v431_v24, %v418_v34  ;;  %v420_v44 = vadd.f32 %v416_v36, %v403_v35  ;;  %v434_v46 = vmul.f32 %v732_v33, %v430_v14  ;;  %v451_v50 = vmul.f32 %v736_v38, %v447_v15  ;;  %v501_v13 = vld [vmem:[%s1612_s30] sm:$0xff] (!%p737_p9)  ;;  %v504_v24 = vld [vmem:[%s1613_s17 + $0x18] sm:$0xff] (!%p737_p9)  ;;  %v529_v36 = vld [vmem:[%s1614_s7 + $0x8] sm:$0xff] (!%p737_p9) }
  0xab   : > { %v436_v48 = vadd.f32 %v432_v31, %v419_v39  ;;  %v421_v49 = vadd.f32 %v417_v42, %v404_v41  ;;  %v511_v15 = vmul.f32 (!%p737_p9), %v738_v12, %v501_v13  ;;  %v512_v17 = vmul.f32 (!%p737_p9), %v738_v12, %v502_v16  ;;  %v528_v31 = vld [vmem:[%s1614_s7] sm:$0xff] (!%p737_p9) }
  0xac   : > { %v452_v51 = vadd.f32 %v448_v28, %v435_v43  ;;  %v437_v53 = vadd.f32 %v433_v37, %v420_v44  ;;  %v513_v22 = vmul.f32 (!%p737_p9), %v738_v12, %v503_v19  ;;  %v514_v26 = vmul.f32 (!%p737_p9), %v738_v12, %v504_v24  ;;  %v530_v43 = vld [vmem:[%s1614_s7 + $0x10] sm:$0xff] (!%p737_p9) }
  0xad   : > { %v453_v54 = vadd.f32 %v449_v40, %v436_v48  ;;  %v438_v56 = vadd.f32 %v434_v46, %v421_v49  ;;  %v516_v20 = vsel (!%p737_p9), %vm515_vm0, %v511_v15, 0.0  ;;  %v519_v21 = vsel (!%p737_p9), %vm515_vm0, %v512_v17, 0.0  ;;  %v531_v49 = vld [vmem:[%s1614_s7 + $0x18] sm:$0xff] (!%p737_p9) }
  0xae   : > { %v460_v57 = vadd.f32 %v456_v47, %v452_v51  ;;  %v454_v58 = vadd.f32 %v450_v45, %v437_v53  ;;  %517 = vadd.xlane.f32.xlu0 (!%p737_p9), %v516_v20  ;;  %v522_v25 = vsel (!%p737_p9), %vm515_vm0, %v513_v22, 0.0  ;;  %v525_v28 = vsel (!%p737_p9), %vm515_vm0, %v514_v26, 0.0 }
  0xaf   : > { %v461_v61 = vadd.f32 %v457_v52, %v453_v54  ;;  %v455_v62 = vadd.f32 %v451_v50, %v438_v56  ;;  %v1092_v29 = vmov (!%p737_p9), 0  }
  0xb0   : > { %v464_v63 = vmax.f32 %v460_v57, 0.0  ;;  %v462_v1 = vadd.f32 %v458_v55, %v454_v58  ;;  %864 = vset.pattern.permute.xlu0 (!%p737_p9), %v1092_v29  ;;  %865 = vset.pattern.permute.xlu1 (!%p737_p9), %v1092_v29  ;;  %v545_v58 = vld [vmem:[%s1615_s19 + $0x8] sm:$0xff] (!%p737_p9) }
  0xb1   : > { %v465_v2 = vmax.f32 %v461_v61, 0.0  ;;  %v463_v4 = vadd.f32 %v459_v59, %v455_v62  ;;  %483 = sbr.rel (%p737_p9) target bundleno = 496 (0x1f0), region = 72  ;;  %v544_v59 = vld [vmem:[%s1615_s19] sm:$0xff] (!%p737_p9) }
  0xb2   : > { %v472_v5 = vadd.f32 %v468_v60, %v464_v63  ;;  %v466_v6 = vmax.f32 %v462_v1, 0.0  ;;  %520 = vadd.xlane.f32.xlu0 (!%p737_p9), %v519_v21  ;;  %v546_v63 = vld [vmem:[%s1615_s19 + $0x10] sm:$0xff] (!%p737_p9) }
  0xb3   : > { %v473_v8 = vadd.f32 %v469_v0, %v465_v2  ;;  %v467_v9 = vmax.f32 %v463_v4, 0.0  ;;  %v547_v4 = vld [vmem:[%s1615_s19 + $0x18] sm:$0xff] (!%p737_p9) }
  0xb4   : > { %476 = vst [vmem:[#allocation2] sm:$0xff] %v472_v5  ;;  %v474_v10 = vadd.f32 %v470_v3, %v466_v6 }
  0xb5   : > { %477 = vst [vmem:[#allocation2 + $0x8] sm:$0xff] %v473_v8  ;;  %v475_v11 = vadd.f32 %v471_v7, %v467_v9 }
  0xb6   : > { %478 = vst [vmem:[#allocation2 + $0x10] sm:$0xff] %v474_v10  ;;  %523 = vadd.xlane.f32.xlu0 (!%p737_p9), %v522_v25 }
  0xb7   : > { %479 = vst [vmem:[#allocation2 + $0x18] sm:$0xff] %v475_v11 }
  0xba   : > { %526 = vadd.xlane.f32.xlu0 %v525_v28 }
  0xbb   : > { %v484_v14 = vld [vmem:[#allocation2] sm:$0xff] }
  0xbc   : > { %488 = vadd.xlane.f32.xlu1 %v484_v14  ;;  %v485_v18 = vld [vmem:[#allocation2 + $0x8] sm:$0xff] }
  0xbd   : > { %v486_v23 = vld [vmem:[#allocation2 + $0x10] sm:$0xff] }
  0xbe   : > { %v487_v27 = vld [vmem:[#allocation2 + $0x18] sm:$0xff] }
  0xc0   : > { %490 = vadd.xlane.f32.xlu1 %v485_v18  ;;  %v586_v18 = vld [vmem:[%s1616_s23] sm:$0x1] }
  0xc4   : > { %492 = vadd.xlane.f32.xlu1 %v486_v23 }
  0xc8   : > { %494 = vadd.xlane.f32.xlu1 %v487_v27 }
 0x13b   : > { %v518_v32 = vpop.xlane.xlu0 %517 }
 0x13c   : > { %v532_v33 = vadd.f32 %v528_v31, %v518_v32 }
 0x13e   : > { %v536_v37 = vmax.f32 %v532_v33, 0.0 }
 0x13f   : > { %v521_v38 = vpop.xlane.xlu0 %520 }
 0x140   : > { %v533_v40 = vadd.f32 %v529_v36, %v521_v38 }
 0x142   : > { %v537_v44 = vmax.f32 %v533_v40, 0.0 }
 0x143   : > { %v524_v45 = vpop.xlane.xlu0 %523 }
 0x144   : > { %v534_v47 = vadd.f32 %v530_v43, %v524_v45 }
 0x146   : > { %v538_v51 = vmax.f32 %v534_v47, 0.0 }
 0x147   : > { %v527_v52 = vpop.xlane.xlu0 %526 }
 0x148   : > { %v535_v54 = vadd.f32 %v531_v49, %v527_v52 }
 0x149   : > { %v489_v30 = vpop.xlane.xlu1 %488 }
 0x14a   : > { %v496_v34 = vmul.f32 0.00390625, %v489_v30  ;;  %v539_v56 = vmax.f32 %v535_v54, 0.0 }
 0x14c   : > { %v540_v39 = vmul.f32 %v536_v37, %v496_v34 }
 0x14d   : > { %v491_v35 = vpop.xlane.xlu1 %490 }
 0x14e   : > { %v497_v41 = vmul.f32 0.00390625, %v491_v35  ;;  %550 = vperm.xlu0 %864, %v540_v39  }
 0x150   : > { %v541_v46 = vmul.f32 %v537_v44, %v497_v41 }
 0x151   : > { %v493_v42 = vpop.xlane.xlu1 %492 }
 0x152   : > { %v498_v48 = vmul.f32 0.00390625, %v493_v42  ;;  %555 = vperm.xlu1 %865, %v541_v46  }
 0x154   : > { %v542_v53 = vmul.f32 %v538_v51, %v498_v48 }
 0x155   : > { %v495_v50 = vpop.xlane.xlu1 %494 }
 0x156   : > { %v499_v55 = vmul.f32 0.00390625, %v495_v50  ;;  %560 = vperm.xlu1 %865, %v542_v53  }
 0x158   : > { %v543_v57 = vmul.f32 %v539_v56, %v499_v55 }
 0x15a   : > { %565 = vperm.xlu1 %865, %v543_v57  }
 0x1cd   : > { %v551_v60 = vpop.permute.xlu0 %550 }
 0x1ce   : > { %v568_v0 = vmul.f32 %v551_v60, %v544_v59 }
 0x1d0   : > { %v573_v5 = vsel %vm572_vm1, %v568_v0, 0.0 }
 0x1d1   : > { %v556_v61 = vpop.permute.xlu1 %555 }
 0x1d2   : > { %v569_v62 = vmul.f32 %v556_v61, %v545_v58 }
 0x1d4   : > { %v574_v2 = vsel %vm572_vm1, %v569_v62, 0.0 }
 0x1d5   : > { %v561_v1 = vpop.permute.xlu1 %560  ;;  %v575_v7 = vadd.f32 %v574_v2, %v573_v5 }
 0x1d6   : > { %v570_v3 = vmul.f32 %v561_v1, %v546_v63 }
 0x1d8   : > { %v576_v6 = vsel %vm572_vm1, %v570_v3, 0.0 }
 0x1d9   : > { %v566_v8 = vpop.permute.xlu1 %565  ;;  %v577_v10 = vadd.f32 %v576_v6, %v575_v7 }
 0x1da   : > { %v571_v9 = vmul.f32 %v566_v8, %v547_v4 }
 0x1dc   : > { %v578_v11 = vsel %vm572_vm1, %v571_v9, 0.0 }
 0x1dd   : > { %v579_v12 = vadd.f32 %v578_v11, %v577_v10 }
 0x1df   : > { %v580_v13 = vrot.slane %v579_v12, 4 }
 0x1e1   : > { %v581_v14 = vadd.f32 %v580_v13, %v579_v12 }
 0x1e3   : > { %v582_v15 = vrot.slane %v581_v14, 2 }
 0x1e5   : > { %v583_v16 = vadd.f32 %v582_v15, %v581_v14 }
 0x1e7   : > { %v584_v17 = vrot.slane %v583_v16, 1 }
 0x1e9   : > { %v585_v19 = vadd.f32 %v584_v17, %v583_v16 }
 0x1eb   : > { %v587_v20 = vadd.f32 %v586_v18, %v585_v19 }
 0x1ed   : > { %v588_v21 = vmax.f32 %v587_v20, 0.0 }
 0x1ef   : > { %590 = vst.msk [vmem:[%s383_s21] sm:$0x1] %vm589_vm2, %v588_v21 }
 0x1f0 PF: > { %s1617_s16 = sld [smem:[#allocation14_spill]]  ;;  %s1618_s6 = sld [smem:[#allocation23_spill]] }
 0x1f1   : > { %s604_s8 = sshll.u32 %s383_s21, 4  ;;  %s592_s18 = scalar_lea.sflag [#allocation5], %s1388_s20  ;;  %s605_s8 = int_to_ptr.vmem [resolvable:$true] %s604_s8 }
 0x1f2   : > { %s954_s30 = scalar_lea.vmem %s605_s8, 16  ;;  %p1619_p1 = scmp.ne.s32.totalorder %s1604_s24, 0 }
 0x1f3   : > { %p955_p5 = scmp.ne.s32.totalorder %s605_s8, %s954_s30  ;;  %s1093_s4 = smov [#allocation9]  }
 0x1f4   : > { %s958_s23 = sshll.u32 %s1093_s4, 4  ;;  %s959_s23 = int_to_ptr.vmem [resolvable:$false] %s958_s23 }
 0x1f5   : > { %p956_p6 = pnand %p955_p5, %p1619_p1  ;;  %s960_s0 = scalar_lea.vmem %s959_s23, 32 }
 0x1f6   : > { %s739_s11 = sshll.u32 %s1617_s16, 4  ;;  %p961_p12 = scmp.lt.s32.totalorder %s605_s8, %s959_s23 }
 0x1f7   : > { %s1501_s5 = scalar_lea.hbm %s1618_s6, %s739_s11  ;;  %p957_p4 = pneg %p956_p6 }
 0x1f8   : > { %p962_p2 = scmp.lt.s32.totalorder %s960_s0, %s954_s30 }
 0x1fa   : > { %p963_p10 = por %p962_p2, %p961_p12 }
 0x1fc   : > { %p964_p13 = pnand %p963_p10, %p957_p4 }
 0x1fe   : > { %967 = shalt.err (!%p964_p13)
}
 0x1ff   : > { %s968_s20 = scalar_lea.hbm %s1501_s5, 16  ;;  %s972_s11 = scalar_lea.hbm %s1618_s6, 32 }
 0x200   : > { %p969_p0 = scmp.ne.s32.totalorder %s1501_s5, %s968_s20  ;;  %p973_p8 = scmp.lt.u32.totalorder %s1501_s5, %s1618_s6 }
 0x201   : > { %p974_p11 = scmp.lt.u32.totalorder %s972_s11, %s968_s20  ;;  %p976_p5 = scmp.lt.u32.totalorder %s968_s20, %s1501_s5 }
 0x202   : > { %p970_p3 = pnand %p969_p0, %p1619_p1 }
 0x203   : > { %p975_p9 = por %p974_p11, %p973_p8 }
 0x204   : > { %p971_p7 = pneg %p970_p3 }
 0x205   : > { %p977_p6 = por %p976_p5, %p975_p9 }
 0x207   : > { %p978_p4 = pnand %p977_p6, %p971_p7 }
 0x209   : > { %981 = shalt.err (!%p978_p4)
}
 0x20a   : > { %750 = dma.vmem_to_hbm [thread:$0]  (%p1619_p1), %s605_s8, 16, %s1501_s5, %s592_s18  }
 0x20b PF: > { %p770_p12 = scmp.ge.s32.totalorder %s1084_s15, 2  ;;  %s616_s0 = sand.u32 1, %s1044_s27  }
 0x20c   : > { %p1620_p2 = scmp.ne.s32.totalorder %s1605_s22, 0  ;;  %s617_s30 = scalar_lea.sflag [#allocation5], %s616_s0 }
 0x20e   : > { %p764_p10 = pnand %p770_p12, %p1620_p2 }
 0x210   : > { %1039 = dma.done.wait (!%p764_p10), %s617_s30, 16  }
 0x211   : > { %1041 = vsyncadd (!%p764_p10), %s617_s30, 4294967280  ;;  %s27_s15 = sadd.s32 1, %s1084_s15   ;;  %s1621_s24 = sld [smem:[#allocation15_spill]] }
 0x212   : > { %p24_p13 = scmp.ge.s32.totalorder %s27_s15, 6   ;;  %s1622_s5 = sld [smem:[#allocation16_spill]] }
 0x213   : > { %s1623_s27 = smov %s1048_s28  ;;  %s1624_s28 = smov %s1052_s29 }
 0x214   : > { %s1625_s29 = smov %s1314_s25  ;;  %s1626_s30 = smov %s1060_s9 }
 0x215   : > { %s1627_s9 = smov %s1064_s10  ;;  %s1628_s10 = smov %s1266_s12 }
 0x216   : > { %s1629_s11 = smov %s1076_s13  ;;  %s1630_s12 = smov %s1080_s14 }
 0x217   : > { %s1631_s13 = smov %s1621_s24  ;;  %26 = sbr.rel (!%p24_p13) target bundleno = 19 (0x13), region = 125 }
 0x218   : > { %s1632_s14 = smov %s1622_s5 }
 0x21e   :  { %621 = vsyncpa [#allocation4], 1 }
 0x21f   :  { %623 = vsyncpa [#allocation4 + $0x1], 1 }
 0x220   :  { %624 = vsyncpa [#allocation7], 1 }
 0x221   :  { %626 = vsyncpa [#allocation7 + $0x1], 1 }
 0x222   :  { %627 = vsyncpa [#allocation5], 1 }
 0x223   :  { %629 = vsyncpa [#allocation5 + $0x1], 1 }

</bundles_post_ra>
